<compile_context>
chip_gen: v6e
topology: v6e:2x2x1
jax: 0.10.0
libtpu: 0.0.40
codegen_flags: <defaults>
</compile_context>

<pallas_src>
import functools

import jax
import jax.numpy as jnp
import numpy as np
from jax.experimental import pallas as pl
from jax.experimental.pallas import tpu as pltpu


# ----------------------------------------------------------------------------
# Pallas kernel: fused qkv matmul + scalar-dot attention + relu + out conv
# ----------------------------------------------------------------------------
def _att_layer_kernel(lens_ref, x_ref, wqkv_ref, bqkv_ref, wo_ref, bo_ref, out_ref,
                      *, bb, cq, ck, cv):
    L = x_ref.shape[1]
    cin = x_ref.shape[2]
    npack = cq + ck + cv

    # Fused q/k/v projection: one matmul over all Bb*L rows.
    x = x_ref[...].reshape(bb * L, cin)                                    # bf16
    qkv = jnp.dot(x, wqkv_ref[...], preferred_element_type=jnp.float32)
    qkv = qkv + bqkv_ref[...]                                              # f32 (bb*L, npack)
    qkv = qkv.reshape(bb, L, npack)

    wo = wo_ref[...]                                                       # bf16 (cv, cpad)
    bo = bo_ref[...]                                                       # f32 (1, cpad)

    inv_sqrt_c1 = np.float32(1.0 / np.sqrt(cq))
    log_one = np.float32(np.log(1.0 + 1e-6))   # additive term for valid keys
    log_eps = np.float32(np.log(1e-6))         # additive term for padded keys

    base = pl.program_id(0) * bb
    key_pos = jax.lax.broadcasted_iota(jnp.int32, (L, L), 1)   # key (column) index
    q_pos = jax.lax.broadcasted_iota(jnp.int32, (L, 1), 0)     # query (row) index

    for i in range(bb):                                        # bb is small & static
        ln = lens_ref[base + i]                                # valid length (scalar, SMEM)

        q = qkv[i, :, 0:cq].astype(jnp.bfloat16)               # (L, cq)
        k = qkv[i, :, cq:cq + ck].astype(jnp.bfloat16)         # (L, ck)
        v = qkv[i, :, cq + ck:npack].astype(jnp.bfloat16)      # (L, cv)

        # energy[i, j] = <q_i, k_j>  (contract last dims; no explicit transpose)
        energy = jax.lax.dot_general(q, k, (((1,), (1,)), ((), ())),
                                     preferred_element_type=jnp.float32)  # (L, L)

        att = energy * inv_sqrt_c1
        kvalid = key_pos < ln
        att = att + jnp.where(kvalid, log_one, log_eps)        # == log(mask + 1e-6)

        # softmax over key positions (f32, EUP reciprocal)
        att = att - jnp.max(att, axis=-1, keepdims=True)
        att = jnp.exp(att)
        att = att * pl.reciprocal(jnp.sum(att, axis=-1, keepdims=True), approx=True)
        att = jnp.where(kvalid, att, jnp.float32(0.0))         # attention * padding_mask

        out = jnp.dot(att.astype(jnp.bfloat16), v,
                      preferred_element_type=jnp.float32)      # (L, cv)
        out = jnp.maximum(out, 0.0)                            # F.relu

        # 1x1 conv_out (weights lane-padded to 128 -> lane-dense store)
        y = jnp.dot(out.astype(jnp.bfloat16), wo,
                    preferred_element_type=jnp.float32) + bo   # (L, cpad)
        qmask = (q_pos < ln).astype(jnp.float32)               # output * mask[:, 0:1, :]
        out_ref[i] = y * qmask


def att_layer_normal(x1, lengths, params, *, batch_block=None):
    """x1: (B, q_dim, L) float32 (NCL).  lengths: (B,) ints, valid length per batch
    (equivalent to mask[b, 0, l] = l < lengths[b]).  Returns (B, v_dim, L) float32."""
    # TODO(synk): arbitrary (non-prefix) float masks would need the mask tensor path back;
    #             this kernel covers the standard length-based padding mask.
    wq, bq, wk, bk, wv, bv, wo, bo = params
    B, Cin, L = x1.shape
    cq, ck, cv = wq.shape[1], wk.shape[1], wv.shape[1]
    cout = wo.shape[1]
    assert wq.shape[0] == wk.shape[0] == wv.shape[0] == Cin
    assert wo.shape[0] == cv

    if batch_block is None:
        # Fold batch into the block, but keep >=2 grid steps when B > 1 (v7x has 2 TCs).
        batch_block = min(8, max(1, (B + 1) // 2))
    nsteps = pl.cdiv(B, batch_block)
    bpad = nsteps * batch_block

    x_t = jnp.transpose(x1, (0, 2, 1)).astype(jnp.bfloat16)     # (B, L, Cin) bf16 MXU operand
    lengths = jnp.asarray(lengths, jnp.int32)
    if bpad != B:
        x_t = jnp.pad(x_t, ((0, bpad - B), (0, 0), (0, 0)))
        lengths = jnp.pad(lengths, (0, bpad - B))               # len 0 -> zero output rows

    # Pack q/k/v projection weights into one matrix; pad output projection to 128 lanes.
    w_qkv = jnp.concatenate([wq, wk, wv], axis=1).astype(jnp.bfloat16)    # (Cin, cq+ck+cv)
    b_qkv = jnp.concatenate([bq, bk, bv], axis=1).astype(jnp.float32)     # (1, cq+ck+cv)
    npack = cq + ck + cv
    cpad = ((cout + 127) // 128) * 128
    wo_p = jnp.zeros((cv, cpad), jnp.float32).at[:, :cout].set(wo).astype(jnp.bfloat16)
    bo_p = jnp.zeros((1, cpad), jnp.float32).at[:, :cout].set(bo)

    kernel = functools.partial(_att_layer_kernel, bb=batch_block, cq=cq, ck=ck, cv=cv)

    out = pl.pallas_call(
        kernel,
        out_shape=jax.ShapeDtypeStruct((bpad, L, cpad), jnp.float32),
        grid_spec=pltpu.PrefetchScalarGridSpec(
            num_scalar_prefetch=1,          # lengths -> SMEM, passed to index_maps too
            grid=(nsteps,),
            in_specs=[
                pl.BlockSpec((batch_block, L, Cin), lambda b, lens: (b, 0, 0)),
                pl.BlockSpec((Cin, npack), lambda b, lens: (0, 0)),
                pl.BlockSpec((1, npack), lambda b, lens: (0, 0)),
                pl.BlockSpec((cv, cpad), lambda b, lens: (0, 0)),
                pl.BlockSpec((1, cpad), lambda b, lens: (0, 0)),
            ],
            out_specs=pl.BlockSpec((batch_block, L, cpad), lambda b, lens: (b, 0, 0)),
        ),
        compiler_params=pltpu.CompilerParams(dimension_semantics=("parallel",)),
    )(lengths, x_t, w_qkv, b_qkv, wo_p, bo_p)

    out = out[:B, :, :cout]                         # drop batch & lane padding
    return jnp.transpose(out, (0, 2, 1))            # (B, v_dim, L)


# ----------------------------------------------------------------------------
# Pure-JAX reference mirroring the PyTorch forward exactly (f32, for validation)
# ----------------------------------------------------------------------------
def ref_forward(x1, mask, params):
    wq, bq, wk, bk, wv, bv, wo, bo = params
    conv1x1 = lambda x, w, b: jnp.einsum('io,bil->bol', w, x) + b[0][:, None]
    q = conv1x1(x1, wq, bq)
    k = conv1x1(x1, wk, bk)
    v = conv1x1(x1, wv, bv)
    B, c1, L = q.shape
    padding_mask = jnp.ones((B, 1, L), jnp.float32) * mask[:, 0:1, :]
    energy = jnp.einsum('bcl,bck->blk', q, k)
    att = energy / np.sqrt(c1) + jnp.log(padding_mask + 1e-6)
    att = jax.nn.softmax(att, axis=-1)
    att = att * padding_mask
    out = jnp.einsum('bcj,bij->bci', v, att)
    out = jax.nn.relu(out)
    out = conv1x1(out, wo, bo)
    return out[:, :, :L] * mask[:, 0:1, :]


# ----------------------------------------------------------------------------
# Deterministic parameter construction (PyTorch-like Conv1d init)
# ----------------------------------------------------------------------------
def make_params(key, q_dim, k_dim, v_dim, r1, r2, r3):
    ks = jax.random.split(key, 8)

    def conv_w(k, out_c, in_c):
        bound = 1.0 / np.sqrt(in_c)
        w = jax.random.uniform(k, (out_c, in_c), jnp.float32, -bound, bound)
        return jnp.transpose(w, (1, 0))          # kernel-side (in, out)

    def conv_b(k, out_c, in_c):
        bound = 1.0 / np.sqrt(in_c)
        return jax.random.uniform(k, (1, out_c), jnp.float32, -bound, bound)

    wq = conv_w(ks[0], q_dim // r1, q_dim); bq = conv_b(ks[1], q_dim // r1, q_dim)
    wk = conv_w(ks[2], k_dim // r2, k_dim); bk = conv_b(ks[3], k_dim // r2, k_dim)
    wv = conv_w(ks[4], v_dim // r3, v_dim); bv = conv_b(ks[5], v_dim // r3, v_dim)
    wo = conv_w(ks[6], v_dim, v_dim // r3); bo = conv_b(ks[7], v_dim, v_dim // r3)
    return (wq, bq, wk, bk, wv, bv, wo, bo)


if __name__ == "__main__":
    # AttLayer(q_dim=32, k_dim=32, v_dim=32, r1=r2=r3=2, bl=8, stage='encoder', att_type='normal_att')
    # TODO(synk): block_att / sliding_att variants (block reshaping + window mask) not implemented;
    #             this kernel covers the 'normal_att' + 'encoder' forward path.
    B, q_dim, L = 2, 32, 64
    r = 2

    key = jax.random.PRNGKey(0)
    kx, kp = jax.random.split(key)
    params = make_params(kp, q_dim, q_dim, q_dim, r, r, r)

    x1 = jax.random.normal(kx, (B, q_dim, L), jnp.float32)
    lengths = jnp.array([L, 48], dtype=jnp.int32)
    mask = (jnp.arange(L)[None, None, :] < lengths[:, None, None]).astype(jnp.float32)  # (B, 1, L)

    y = att_layer_normal(x1, lengths, params)
    y = jax.block_until_ready(y)

    y_ref = jax.block_until_ready(ref_forward(x1, mask, params))
    # bf16 MXU operands (f32 accumulation) -> looser tolerance than the pure-f32 reference.
    np.testing.assert_allclose(np.asarray(y), np.asarray(y_ref), rtol=2e-2, atol=2e-2)

    print("KERNEL_OK")
</pallas_src>

<mosaic_0001>
module attributes {stable_mosaic.version = 11 : i64} {
  func.func @_att_layer_kernel(%arg0: i32, %arg1: memref<2xi32, #tpu.memory_space<smem>>, %arg2: memref<1x64x32xbf16, #tpu.memory_space<vmem>>, %arg3: memref<32x48xbf16, #tpu.memory_space<vmem>>, %arg4: memref<1x48xf32, #tpu.memory_space<vmem>>, %arg5: memref<16x128xbf16, #tpu.memory_space<vmem>>, %arg6: memref<1x128xf32, #tpu.memory_space<vmem>>, %arg7: memref<1x64x128xf32, #tpu.memory_space<vmem>>) attributes {dimension_semantics = [#tpu.dimension_semantics<parallel>], iteration_bounds = array<i64: 2>, scalar_prefetch = 1 : i64, scratch_operands = 0 : i64, tpu.core_type = #tpu.core_type<tc>, window_params = [{transform_indices = @transform_0, window_bounds = array<i64: 1, 64, 32>}, {pipeline_mode = #tpu.pipeline_mode<synchronous>, transform_indices = @transform_1, window_bounds = array<i64: 32, 48>}, {pipeline_mode = #tpu.pipeline_mode<synchronous>, transform_indices = @transform_2, window_bounds = array<i64: 1, 48>}, {pipeline_mode = #tpu.pipeline_mode<synchronous>, transform_indices = @transform_3, window_bounds = array<i64: 16, 128>}, {pipeline_mode = #tpu.pipeline_mode<synchronous>, transform_indices = @transform_4, window_bounds = array<i64: 1, 128>}, {transform_indices = @transform_5, window_bounds = array<i64: 1, 64, 128>}]} {
    %c0 = arith.constant 0 : index
    %c0_0 = arith.constant 0 : index
    %c0_1 = arith.constant 0 : index
    %0 = vector.load %arg2[%c0, %c0_0, %c0_1] : memref<1x64x32xbf16, #tpu.memory_space<vmem>>, vector<1x64x32xbf16>
    %1 = vector.shape_cast %0 : vector<1x64x32xbf16> to vector<64x32xbf16>
    %c0_2 = arith.constant 0 : index
    %c0_3 = arith.constant 0 : index
    %2 = vector.load %arg3[%c0_2, %c0_3] : memref<32x48xbf16, #tpu.memory_space<vmem>>, vector<32x48xbf16>
    %cst = arith.constant dense<0.000000e+00> : vector<64x48xf32>
    %3 = tpu.matmul %1, %2, %cst {dimension_numbers = #tpu.dot_dimension_numbers<[1], [0], [0], [1], [0, 0, 1, 1], [], []>} : vector<64x32xbf16>, vector<32x48xbf16>, vector<64x48xf32> -> vector<64x48xf32>
    %c0_4 = arith.constant 0 : index
    %c0_5 = arith.constant 0 : index
    %4 = vector.load %arg4[%c0_4, %c0_5] : memref<1x48xf32, #tpu.memory_space<vmem>>, vector<1x48xf32>
    %5 = vector.broadcast %4 : vector<1x48xf32> to vector<64x48xf32>
    %6 = arith.addf %3, %5 : vector<64x48xf32>
    %7 = vector.shape_cast %6 : vector<64x48xf32> to vector<1x64x48xf32>
    %c0_6 = arith.constant 0 : index
    %c0_7 = arith.constant 0 : index
    %8 = vector.load %arg5[%c0_6, %c0_7] : memref<16x128xbf16, #tpu.memory_space<vmem>>, vector<16x128xbf16>
    %c0_8 = arith.constant 0 : index
    %c0_9 = arith.constant 0 : index
    %9 = vector.load %arg6[%c0_8, %c0_9] : memref<1x128xf32, #tpu.memory_space<vmem>>, vector<1x128xf32>
    %c1_i32 = arith.constant 1 : i32
    %10 = arith.muli %arg0, %c1_i32 : i32
    %11 = tpu.iota {dimensions = array<i32: 1>} : vector<64x64xi32>
    %12 = tpu.iota {dimensions = array<i32: 0>} : vector<64x1xi32>
    %c0_i32 = arith.constant 0 : i32
    %13 = arith.addi %10, %c0_i32 : i32
    %14 = arith.index_cast %13 : i32 to index
    %15 = memref.load %arg1[%14] : memref<2xi32, #tpu.memory_space<smem>>
    %16 = vector.extract_strided_slice %7 {offsets = [0, 0, 0], sizes = [1, 64, 16], strides = [1, 1, 1]} : vector<1x64x48xf32> to vector<1x64x16xf32>
    %17 = vector.shape_cast %16 : vector<1x64x16xf32> to vector<64x16xf32>
    %18 = arith.truncf %17 : vector<64x16xf32> to vector<64x16xbf16>
    %19 = vector.extract_strided_slice %7 {offsets = [0, 0, 16], sizes = [1, 64, 16], strides = [1, 1, 1]} : vector<1x64x48xf32> to vector<1x64x16xf32>
    %20 = vector.shape_cast %19 : vector<1x64x16xf32> to vector<64x16xf32>
    %21 = arith.truncf %20 : vector<64x16xf32> to vector<64x16xbf16>
    %22 = vector.extract_strided_slice %7 {offsets = [0, 0, 32], sizes = [1, 64, 16], strides = [1, 1, 1]} : vector<1x64x48xf32> to vector<1x64x16xf32>
    %23 = vector.shape_cast %22 : vector<1x64x16xf32> to vector<64x16xf32>
    %24 = arith.truncf %23 : vector<64x16xf32> to vector<64x16xbf16>
    %cst_10 = arith.constant dense<0.000000e+00> : vector<64x64xf32>
    %25 = tpu.matmul %18, %21, %cst_10 {dimension_numbers = #tpu.dot_dimension_numbers<[1], [1], [0], [0], [0, 0, 1, 0], [], []>} : vector<64x16xbf16>, vector<64x16xbf16>, vector<64x64xf32> -> vector<64x64xf32>
    %cst_11 = arith.constant 2.500000e-01 : f32
    %26 = vector.broadcast %cst_11 : f32 to vector<64x64xf32>
    %27 = arith.mulf %25, %26 : vector<64x64xf32>
    %28 = vector.broadcast %15 : i32 to vector<64x64xi32>
    %29 = arith.cmpi slt, %11, %28 : vector<64x64xi32>
    %cst_12 = arith.constant 9.99999543E-7 : f32
    %cst_13 = arith.constant -13.8155107 : f32
    %30 = vector.broadcast %cst_12 : f32 to vector<64x64xf32>
    %31 = vector.broadcast %cst_13 : f32 to vector<64x64xf32>
    %32 = arith.select %29, %30, %31 : vector<64x64xi1>, vector<64x64xf32>
    %33 = arith.addf %27, %32 : vector<64x64xf32>
    %cst_14 = arith.constant dense<0xFF800000> : vector<64xf32>
    %34 = vector.multi_reduction <maximumf>, %33, %cst_14 [1] : vector<64x64xf32> to vector<64xf32>
    %35 = vector.shape_cast %34 : vector<64xf32> to vector<64x1xf32>
    %36 = vector.broadcast %35 : vector<64x1xf32> to vector<64x64xf32>
    %37 = arith.subf %33, %36 : vector<64x64xf32>
    %38 = math.exp %37 : vector<64x64xf32>
    %cst_15 = arith.constant dense<0.000000e+00> : vector<64xf32>
    %39 = vector.multi_reduction <add>, %38, %cst_15 [1] : vector<64x64xf32> to vector<64xf32>
    %40 = vector.shape_cast %39 : vector<64xf32> to vector<64x1xf32>
    %41 = tpu.reciprocal %40 {approx = true} : vector<64x1xf32> -> vector<64x1xf32>
    %42 = vector.broadcast %41 : vector<64x1xf32> to vector<64x64xf32>
    %43 = arith.mulf %38, %42 : vector<64x64xf32>
    %cst_16 = arith.constant 0.000000e+00 : f32
    %44 = vector.broadcast %cst_16 : f32 to vector<64x64xf32>
    %45 = arith.select %29, %43, %44 : vector<64x64xi1>, vector<64x64xf32>
    %46 = arith.truncf %45 : vector<64x64xf32> to vector<64x64xbf16>
    %cst_17 = arith.constant dense<0.000000e+00> : vector<64x16xf32>
    %47 = tpu.matmul %46, %24, %cst_17 {dimension_numbers = #tpu.dot_dimension_numbers<[1], [0], [0], [1], [0, 0, 1, 1], [], []>} : vector<64x64xbf16>, vector<64x16xbf16>, vector<64x16xf32> -> vector<64x16xf32>
    %cst_18 = arith.constant 0.000000e+00 : f32
    %48 = vector.broadcast %cst_18 : f32 to vector<64x16xf32>
    %49 = arith.maximumf %47, %48 : vector<64x16xf32>
    %50 = arith.truncf %49 : vector<64x16xf32> to vector<64x16xbf16>
    %cst_19 = arith.constant dense<0.000000e+00> : vector<64x128xf32>
    %51 = tpu.matmul %50, %8, %cst_19 {dimension_numbers = #tpu.dot_dimension_numbers<[1], [0], [0], [1], [0, 0, 1, 1], [], []>} : vector<64x16xbf16>, vector<16x128xbf16>, vector<64x128xf32> -> vector<64x128xf32>
    %52 = vector.broadcast %9 : vector<1x128xf32> to vector<64x128xf32>
    %53 = arith.addf %51, %52 : vector<64x128xf32>
    %54 = vector.broadcast %15 : i32 to vector<64x1xi32>
    %55 = arith.cmpi slt, %12, %54 : vector<64x1xi32>
    %56 = arith.extui %55 : vector<64x1xi1> to vector<64x1xi32>
    %57 = arith.sitofp %56 : vector<64x1xi32> to vector<64x1xf32>
    %58 = vector.broadcast %57 : vector<64x1xf32> to vector<64x128xf32>
    %59 = arith.mulf %53, %58 : vector<64x128xf32>
    %c0_20 = arith.constant 0 : index
    %c0_21 = arith.constant 0 : index
    %c0_22 = arith.constant 0 : index
    %60 = vector.load %arg7[%c0_20, %c0_21, %c0_22] : memref<1x64x128xf32, #tpu.memory_space<vmem>>, vector<1x64x128xf32>
    %61 = vector.shape_cast %60 : vector<1x64x128xf32> to vector<64x128xf32>
    %62 = vector.shape_cast %59 : vector<64x128xf32> to vector<1x64x128xf32>
    tpu.vector_store %arg7[%c0_20, %c0_21, %c0_22], %62 {strides = array<i32>} : memref<1x64x128xf32, #tpu.memory_space<vmem>>, vector<1x64x128xf32>,
    return
  }
  func.func @transform_0(%arg0: i32, %arg1: memref<2xi32, #tpu.memory_space<smem>>) -> (i32, i32, i32) {
    %c0_i32 = arith.constant 0 : i32
    %c0_i32_0 = arith.constant 0 : i32
    %c0_i32_1 = arith.constant 0 : i32
    return %arg0, %c0_i32, %c0_i32_0 : i32, i32, i32
  }
  func.func @transform_1(%arg0: i32, %arg1: memref<2xi32, #tpu.memory_space<smem>>) -> (i32, i32) {
    %c0_i32 = arith.constant 0 : i32
    %c0_i32_0 = arith.constant 0 : i32
    %c0_i32_1 = arith.constant 0 : i32
    return %c0_i32, %c0_i32_0 : i32, i32
  }
  func.func @transform_2(%arg0: i32, %arg1: memref<2xi32, #tpu.memory_space<smem>>) -> (i32, i32) {
    %c0_i32 = arith.constant 0 : i32
    %c0_i32_0 = arith.constant 0 : i32
    %c0_i32_1 = arith.constant 0 : i32
    return %c0_i32, %c0_i32_0 : i32, i32
  }
  func.func @transform_3(%arg0: i32, %arg1: memref<2xi32, #tpu.memory_space<smem>>) -> (i32, i32) {
    %c0_i32 = arith.constant 0 : i32
    %c0_i32_0 = arith.constant 0 : i32
    %c0_i32_1 = arith.constant 0 : i32
    return %c0_i32, %c0_i32_0 : i32, i32
  }
  func.func @transform_4(%arg0: i32, %arg1: memref<2xi32, #tpu.memory_space<smem>>) -> (i32, i32) {
    %c0_i32 = arith.constant 0 : i32
    %c0_i32_0 = arith.constant 0 : i32
    %c0_i32_1 = arith.constant 0 : i32
    return %c0_i32, %c0_i32_0 : i32, i32
  }
  func.func @transform_5(%arg0: i32, %arg1: memref<2xi32, #tpu.memory_space<smem>>) -> (i32, i32, i32) {
    %c0_i32 = arith.constant 0 : i32
    %c0_i32_0 = arith.constant 0 : i32
    %c0_i32_1 = arith.constant 0 : i32
    return %arg0, %c0_i32, %c0_i32_0 : i32, i32, i32
  }
}

</mosaic_0001>

<bundles_post_ra>
// kernel: tpu_custom_call.1
= control target key start
LH: loop header
LB: loop body
LE: loop exit
PB: predicated region body
PF: predicated region fallthrough
CT: control target
= control target key end

     0   :  { %s1478_s0 = inlined_call_operand.vmem [shape: s32[2], index: 0, kind: input, shape index: {}]   ;;  %s1479_s1 = inlined_call_operand.vmem [shape: bf16[2,64,32], index: 1, kind: input, shape index: {}]   ;;  %s1480_s2 = inlined_call_operand.vmem [shape: bf16[32,48], index: 2, kind: input, shape index: {}]   ;;  %s1481_s3 = inlined_call_operand.vmem [shape: f32[1,48], index: 3, kind: input, shape index: {}]   ;;  %s1482_s4 = inlined_call_operand.vmem [shape: bf16[16,128], index: 4, kind: input, shape index: {}]   ;;  %s1483_s5 = inlined_call_operand.vmem [shape: f32[1,128], index: 5, kind: input, shape index: {}]   ;;  %s1484_s6 = inlined_call_operand.hbm [shape: f32[2,64,128], index: 6, kind: output, shape index: {}]  }
   0x1   :  { %s11_s23 = sshll.u32 %s1478_s0, 4  ;;  %s12_s23 = int_to_ptr.vmem [resolvable:$true] %s11_s23 }
   0x2   :  { %s1124_s24 = scalar_lea.vmem %s12_s23, 16  ;;  %p1129_p1 = scmp.lt.s32.totalorder %s12_s23, %s12_s23 }
   0x3   :  { %p1125_p0 = scmp.ne.s32.totalorder %s12_s23, %s1124_s24  ;;  %p1130_p2 = scmp.lt.s32.totalorder %s1124_s24, %s1124_s24 }
   0x5   :  { %p1131_p3 = por %p1130_p2, %p1129_p1 }
   0x7   :  { %p1132_p4 = pnand %p1131_p3, %p1125_p0 }
   0x9   :  { %1135 = shalt.err (!%p1132_p4)  }
   0xa   :  { %s1200_s25 = smov [#allocation3]  }
   0xb   :  { %14 = dma.vmem_to_smem %s12_s23, 16, %s1200_s25, [#allocation2] }
   0xc   :  { %1178 = dma.done.wait [#allocation2], 16 }
   0xd   :  { %1179 = vsyncadd [#allocation2], 4294967280 }
   0xe   :  { %16 = sfence }
   0xf   :  { %17 = vsyncpa [#allocation5], 0 }
  0x10   :  { %19 = vsyncpa [#allocation5 + $0x1], 0  ;;  %s1246_s26 = smov 0   ;;  %s1248_s27 = smov 0  }
  0x11   :  { %s1250_s0 = smov 0   ;;  %s1252_s28 = smov 0  }
  0x12 LB: > { %s1267_s29 = sadd.s32 4294967295, %s1198_s28   ;;  %s907_s30 = sadd.s32 4294967294, %s1198_s28   ;;  %s1198_s28 = sphi %s1252_s28, %s1492_s28   ;;  %s1194_s0 = sphi %s1250_s0, %s1491_s0   ;;  %s1190_s27 = sphi %s1248_s27, %s1490_s27   ;;  %s1186_s26 = sphi %s1246_s26, %s1489_s26  }
  0x13   : > { %s1271_s7 = sadd.s32 1, %s1198_s28   ;;  %s142_s8 = sadd.s32 1, %s1194_s0 }
  0x14   : > { %s139_s9 = ssub.s32 %s1198_s28, %s1271_s7  ;;  %p152_p5 = scmp.ne.s32.totalorder %s1194_s0, %s1190_s27 }
  0x15   : > { %p140_p6 = scmp.eq.s32.totalorder %s139_s9, 0  ;;  %p153_p7 = scmp.eq.s32.totalorder %s1267_s29, 1 }
  0x16   : > { %p158_p8 = scmp.ne.s32.totalorder %s1190_s27, %s1186_s26  ;;  %p159_p9 = scmp.eq.s32.totalorder %s907_s30, 1 }
  0x17   : > { %s1282_s10 = scalar_select %p140_p6, %s1194_s0, %s142_s8  }
  0x18   : > { %p1284_p10 = por %p153_p7, %p152_p5  ;;  %p1288_p11 = por %p159_p9, %p158_p8 }
  0x19   : > { %p910_p12 = scmp.ge.s32.totalorder %s1198_s28, 1  ;;  %p197_p13 = scmp.lt.s32.totalorder %s1198_s28, 3 }
  0x1b   : > { %p198_p0 = pnand %p910_p12, %p197_p13 }
  0x1c   : > { %p225_p1 = scmp.lt.s32.totalorder (!%p198_p0), %s1267_s29, 1  ;;  %s1201_s24 = smov (!%p198_p0), 112  }
  0x1d   : > { %201 = sbr.rel (%p198_p0) target bundleno = 1359 (0x54f), region = 40  ;;  %s374_s25 = sld [smem:[#allocation3 + %s1267_s29]] (!%p198_p0) }
  0x1e   : > { %s1203_s30 = smov (!%p198_p0), 96   ;;  %s222_s13 = sand.u32 (!%p198_p0), 1, %s1190_s27  }
  0x1f   : > { %s911_s16 = sshll.u32 (!%p198_p0), %s222_s13, 6 }
  0x22   : > { %v1085_v0 = vld [vmem:[%s1480_s2 + $0x8] sm:$0xff]   ;;  %v1086_v1 = vld [vmem:[%s1480_s2] sm:$0xff]   ;;  %s226_s17 = scalar_select %p225_p1, %s1267_s29, 1  ;;  %vm282_vm0 = vcmask 261120   ;;  %vm391_vm1 = vcmask 130048   ;;  %v363_v35 = vlaneseq  ;;  %vm500_vm3 = vcmask 523264  }
  0x23   : > { %981 = vmatprep.subr.bf16.mxu0 %v1085_v0  ;;  %v914_v7 = vld [vmem:[%s1481_s3] ss:$0 sm:$0xff]  ;;  %v1338_v37 = vstv %s374_s25  ;;  %v1202_v44 = vmov -13.815511  }
  0x24   : > { %982 = vmatpush3.bf16.msra.mxu0 %v1085_v0  ;;  %s952_s18 = sshll.u32 %s226_s17, 5  ;;  %v364_v36 = vand.u32 127, %v363_v35  ;;  %s1413_s17 = scalar_lea.vmem [#allocation4], %s911_s16 }
  0x25   : > { %983 = vmatprep.subr.bf16.mxu0 %v1086_v1  ;;  %s229_s21 = scalar_lea.vmem %s1479_s1, %s952_s18  ;;  %s953_s18 = sshll.u32 %s1267_s29, 10 }
  0x26   : > { %v1087_v2 = vld [vmem:[%s229_s21] sm:$0xff]   ;;  %v1088_v3 = vld [vmem:[%s229_s21 + $0x8] sm:$0xff]   ;;  %v1089_v4 = vld [vmem:[%s229_s21 + $0x10] sm:$0xff]   ;;  %vm1341_vm2 = vcmp.lt.s32.totalorder %v364_v36, %v1338_v37  ;;  %s845_s19 = sshll.u32 %s1413_s17, 4  ;;  %s1430_s22 = scalar_lea.hbm %s1484_s6, %s953_s18  ;;  %s1432_s19 = int_to_ptr.vmem [resolvable:$true] %s845_s19 }
  0x27   : > { %985 = vmatprep.mubr.msk.bf16.mxu0 %vm282_vm0, %v1087_v2  ;;  %v1090_v5 = vld [vmem:[%s229_s21 + $0x18] sm:$0xff]   ;;  %v491_v45 = vsel %vm1341_vm2, 9.999995e-07, %v1202_v44  ;;  %s1438_s29 = scalar_lea.sflag [#allocation5], %s222_s13  ;;  %s1136_s23 = scalar_lea.vmem %s1432_s19, 1024 }
  0x28   : > { %984 = vmatpush3.bf16.msra.mxu0 %v1086_v1  ;;  %p1137_p2 = scmp.ne.s32.totalorder %s1432_s19, %s1136_s23 }
  0x2a   : > { %p1138_p3 = pnand %p1137_p2, %p1284_p10 }
  0x2b   : > { %986 = vmatmul.mubr.msk.bf16.vlgmr.msra.gmra.mxu0 %vm282_vm0, %v1088_v3 }
  0x2c   : > { %989 = vmatprep.mubr.msk.bf16.mxu0 %vm282_vm0, %v1089_v4  ;;  %p1139_p4 = pneg %p1138_p3 }
  0x33   : > { %990 = vmatmul.mubr.msk.bf16.gmra.mxu0 %vm282_vm0, %v1090_v5 }
  0xeb   : > { %v987_v6 = vpop.f32.mrf.mxu0 }
  0xec   : > { %v338_v10 = vadd.f32 %v987_v6, %v914_v7 }
  0xed   : > { %v329_v8 = vpop.f32.mrf.mxu0 }
  0xee   : > { %v330_v13 = vadd.f32 %v914_v7, %v329_v8 }
  0xef   : > { %v988_v9 = vpop.f32.mrf.mxu0 }
  0xf0   : > { %v341_v11 = vadd.f32 %v988_v9, %v914_v7 }
  0xf1   : > { %v332_v12 = vpop.f32.mrf.mxu0 }
  0xf2   : > { %v1308_v14 = vpack.c.bf16 %v341_v11, %v338_v10  ;;  %v333_v15 = vadd.f32 %v914_v7, %v332_v12 }
  0xf3   : > { %v991_v16 = vpop.f32.mrf.mxu0 }
  0xf4   : > { %v1310_v17 = vpack.c.bf16 %v333_v15, %v330_v13  ;;  %385 = vrot.lane.b32.xlu1 %v1308_v14, %s1201_s24  ;;  %v354_v20 = vadd.f32 %v991_v16, %v914_v7 }
  0xf5   : > { %v345_v18 = vpop.f32.mrf.mxu0 }
  0xf6   : > { %1001 = vmatprep.mubr.msk.bf16.mxu1 %vm391_vm1, %v1310_v17  ;;  %v346_v25 = vadd.f32 %v914_v7, %v345_v18 }
  0xf7   : > { %v992_v19 = vpop.f32.mrf.mxu0 }
  0xf8   : > { %v357_v21 = vadd.f32 %v992_v19, %v914_v7  ;;  %383 = vrot.lane.b32.xlu1 %v1310_v17, %s1201_s24 }
  0xf9   : > { %v348_v22 = vpop.f32.mrf.mxu0 }
  0xfa   : > { %v1316_v23 = vpack.c.bf16 %v357_v21, %v354_v20  ;;  %v349_v24 = vadd.f32 %v914_v7, %v348_v22 }
  0xfc   : > { %389 = vrot.lane.b32.xlu0 %v1316_v23, %s1201_s24  ;;  %v1319_v26 = vpack.c.bf16 %v349_v24, %v346_v25 }
 0x100   : > { %387 = vrot.lane.b32.xlu0 %v1319_v26, %s1201_s24  ;;  %s1205_s24 = smov [#allocation4]  }
 0x101   : > { %s1140_s25 = sshll.u32 %s1205_s24, 4  ;;  %s1141_s25 = int_to_ptr.vmem [resolvable:$false] %s1140_s25 }
 0x102   : > { %p1143_p5 = scmp.lt.s32.totalorder %s1432_s19, %s1141_s25 }
 0x166   : > { %v386_v31 = vpop.permute.xlu1 %385 }
 0x167   : > { %v408_v32 = vsel %vm391_vm1, %v386_v31, 0 }
 0x16a   : > { %v384_v33 = vpop.permute.xlu1 %383 }
 0x16b   : > { %v405_v34 = vsel %vm391_vm1, %v384_v33, 0 }
 0x16e   : > { %v390_v27 = vpop.permute.xlu0 %389 }
 0x16f   : > { %1035 = vmatprep.subr.msk.bf16.mxu1 %vm391_vm1, %v390_v27  ;;  %v414_v28 = vsel %vm391_vm1, %v390_v27, 0 }
 0x170   : > { %994 = vmatpush3.bf16.xpose.msra.mxu1 %v414_v28 }
 0x172   : > { %v388_v29 = vpop.permute.xlu0 %387 }
 0x173   : > { %1036 = vmatprep.subr.msk.bf16.mxu1 %vm391_vm1, %v388_v29  ;;  %v411_v30 = vsel %vm391_vm1, %v388_v29, 0 }
 0x178   : > { %996 = vmatpush3.bf16.xpose.msra.mxu1 %v411_v30 }
 0x179   : > { %1037 = vmatprep.subr.msk.bf16.mxu1 %vm391_vm1, %v386_v31 }
 0x180   : > { %998 = vmatpush3.bf16.xpose.msra.mxu1 %v408_v32 }
 0x181   : > { %1038 = vmatprep.subr.msk.bf16.mxu1 %vm391_vm1, %v384_v33 }
 0x188   : > { %1000 = vmatpush3.bf16.xpose.msra.mxu1 %v405_v34 }
 0x18f   : > { %1002 = vmatmul.mubr.msk.bf16.vlgmr.msra.gmra.mxu1 %vm391_vm1, %v1308_v14 }
 0x190   : > { %1005 = vmatprep.mubr.msk.bf16.mxu1 %vm391_vm1, %v1319_v26 }
 0x197   : > { %1006 = vmatmul.mubr.msk.bf16.gmra.mxu1 %vm391_vm1, %v1316_v23 }
 0x24f   : > { %v1003_v38 = vpop.f32.mrf.mxu1 }
 0x250   : > { %v483_v41 = vmul.f32 0.25, %v1003_v38 }
 0x251   : > { %v450_v40 = vpop.f32.mrf.mxu1 }
 0x252   : > { %v481_v42 = vmul.f32 0.25, %v450_v40  ;;  %v494_v51 = vadd.f32 %v491_v45, %v483_v41 }
 0x253   : > { %v1004_v43 = vpop.f32.mrf.mxu1 }
 0x254   : > { %v492_v46 = vadd.f32 %v491_v45, %v481_v42  ;;  %v484_v47 = vmul.f32 0.25, %v1004_v43  ;;  %v507_v58 = vsel %vm500_vm3, %v494_v51, -inf }
 0x255   : > { %v453_v48 = vpop.f32.mrf.mxu1 }
 0x256   : > { %v482_v49 = vmul.f32 0.25, %v453_v48  ;;  %v501_v50 = vsel %vm500_vm3, %v492_v46, -inf  ;;  %v495_v55 = vadd.f32 %v491_v45, %v484_v47 }
 0x257   : > { %502 = vmax.xlane.f32.xlu0 %v501_v50  ;;  %v1007_v52 = vpop.f32.mrf.mxu1 }
 0x258   : > { %v493_v53 = vadd.f32 %v491_v45, %v482_v49  ;;  %v487_v56 = vmul.f32 0.25, %v1007_v52  ;;  %v510_v63 = vsel %vm500_vm3, %v495_v55, -inf }
 0x259   : > { %v466_v54 = vpop.f32.mrf.mxu1 }
 0x25a   : > { %v485_v57 = vmul.f32 0.25, %v466_v54  ;;  %v504_v59 = vsel %vm500_vm3, %v493_v53, -inf  ;;  %v498_v3 = vadd.f32 %v491_v45, %v487_v56 }
 0x25b   : > { %508 = vmax.xlane.f32.xlu0 %v507_v58  ;;  %505 = vmax.xlane.f32.xlu1 %v504_v59  ;;  %v1008_v60 = vpop.f32.mrf.mxu1 }
 0x25c   : > { %v496_v61 = vadd.f32 %v491_v45, %v485_v57  ;;  %v488_v0 = vmul.f32 0.25, %v1008_v60  ;;  %v519_v5 = vsel %vm500_vm3, %v498_v3, -inf }
 0x25d   : > { %v469_v62 = vpop.f32.mrf.mxu1 }
 0x25e   : > { %v486_v1 = vmul.f32 0.25, %v469_v62  ;;  %v513_v2 = vsel %vm500_vm3, %v496_v61, -inf  ;;  %v499_v7 = vadd.f32 %v491_v45, %v488_v0 }
 0x25f   : > { %511 = vmax.xlane.f32.xlu0 %v510_v63  ;;  %514 = vmax.xlane.f32.xlu1 %v513_v2 }
 0x260   : > { %v497_v4 = vadd.f32 %v491_v45, %v486_v1  ;;  %v522_v8 = vsel %vm500_vm3, %v499_v7, -inf }
 0x262   : > { %v516_v6 = vsel %vm500_vm3, %v497_v4, -inf }
 0x263   : > { %520 = vmax.xlane.f32.xlu1 %v519_v5  ;;  %517 = vmax.xlane.f32.xlu0 %v516_v6 }
 0x267   : > { %523 = vmax.xlane.f32.xlu0 %v522_v8 }
 0x274   : > { %607 = vrot.lane.b32.xlu1 %v1316_v23, %s1203_s30 }
 0x2e0   : > { %v503_v9 = vpop.xlane.xlu0 %502 }
 0x2e1   : > { %v525_v10 = vsub.f32 %v492_v46, %v503_v9 }
 0x2e3   : > { %v533_v15 = vmul.f32 1.442695, %v525_v10 }
 0x2e4   : > { %v509_v11 = vpop.xlane.xlu0 %508  ;;  %v506_v12 = vpop.xlane.xlu1 %505 }
 0x2e5   : > { %v527_v13 = vsub.f32 %v494_v51, %v509_v11  ;;  %v526_v18 = vsub.f32 %v493_v53, %v506_v12  ;;  %v1091_v12 = vld [vmem:[%s1482_s4] sm:$0xff]  }
 0x2e7   : > { %v537_v16 = vmul.f32 1.442695, %v527_v13  ;;  %v535_v22 = vmul.f32 1.442695, %v526_v18 }
 0x2e8   : > { %v512_v19 = vpop.xlane.xlu0 %511  ;;  %v515_v20 = vpop.xlane.xlu1 %514 }
 0x2e9   : > { %1092 = vpow2.f32 %v537_v16  ;;  %v528_v21 = vsub.f32 %v495_v55, %v512_v19  ;;  %v529_v25 = vsub.f32 %v496_v61, %v515_v20 }
 0x2ea   : > { %1094 = vpow2.f32 %v533_v15 }
 0x2eb   : > { %v539_v24 = vmul.f32 1.442695, %v528_v21  ;;  %v541_v29 = vmul.f32 1.442695, %v529_v25 }
 0x2ec   : > { %v521_v27 = vpop.xlane.xlu1 %520  ;;  %v518_v28 = vpop.xlane.xlu0 %517 }
 0x2ed   : > { %1096 = vpow2.f32 %v539_v24  ;;  %v531_v23 = vsub.f32 %v498_v3, %v521_v27  ;;  %v530_v31 = vsub.f32 %v497_v4, %v518_v28 }
 0x2ee   : > { %1098 = vpow2.f32 %v535_v22 }
 0x2ef   : > { %v545_v30 = vmul.f32 1.442695, %v531_v23  ;;  %v543_v36 = vmul.f32 1.442695, %v530_v31 }
 0x2f0   : > { %v608_v32 = vpop.permute.xlu1 %607  ;;  %v524_v33 = vpop.xlane.xlu0 %523 }
 0x2f1   : > { %1100 = vpow2.f32 %v545_v30  ;;  %v532_v34 = vsub.f32 %v499_v7, %v524_v33  ;;  %1009 = vmatprep.subr.bf16.mxu0 %v608_v32 }
 0x2f2   : > { %1010 = vmatpush3.bf16.msra.mxu0 %v608_v32  ;;  %1102 = vpow2.f32 %v541_v29 }
 0x2f3   : > { %v547_v38 = vmul.f32 1.442695, %v532_v34 }
 0x2f5   : > { %1104 = vpow2.f32 %v547_v38 }
 0x2f6   : > { %v1093_v40 = vpop.eup %1092  ;;  %1106 = vpow2.f32 %v543_v36 }
 0x2f7   : > { %v555_v41 = vsel %vm500_vm3, %v1093_v40, 0.0  ;;  %v1095_v42 = vpop.eup %1094 }
 0x2f8   : > { %556 = vadd.xlane.f32.xlu1 %v555_v41  ;;  %v549_v44 = vsel %vm500_vm3, %v1095_v42, 0.0 }
 0x2fa   : > { %v1097_v43 = vpop.eup %1096 }
 0x2fb   : > { %v558_v45 = vsel %vm500_vm3, %v1097_v43, 0.0  ;;  %v1099_v46 = vpop.eup %1098 }
 0x2fc   : > { %550 = vadd.xlane.f32.xlu1 %v549_v44  ;;  %559 = vadd.xlane.f32.xlu0 %v558_v45  ;;  %v552_v49 = vsel %vm500_vm3, %v1099_v46, 0.0 }
 0x2fe   : > { %v1360_v47 = vpop.eup %1100 }
 0x2ff   : > { %v567_v48 = vsel %vm500_vm3, %v1360_v47, 0.0  ;;  %v1103_v50 = vpop.eup %1102 }
 0x300   : > { %568 = vadd.xlane.f32.xlu1 %v567_v48  ;;  %553 = vadd.xlane.f32.xlu0 %v552_v49  ;;  %v561_v52 = vsel %vm500_vm3, %v1103_v50, 0.0 }
 0x302   : > { %v1105_v51 = vpop.eup %1104 }
 0x303   : > { %v570_v53 = vsel %vm500_vm3, %v1105_v51, 0.0  ;;  %v1107_v54 = vpop.eup %1106 }
 0x304   : > { %562 = vadd.xlane.f32.xlu1 %v561_v52  ;;  %571 = vadd.xlane.f32.xlu0 %v570_v53  ;;  %v564_v55 = vsel %vm500_vm3, %v1107_v54, 0.0 }
 0x308   : > { %565 = vadd.xlane.f32.xlu0 %v564_v55 }
 0x315   : > { %603 = vrot.lane.b32.xlu1 %v1308_v14, %s1203_s30 }
 0x319   : > { %601 = vrot.lane.b32.xlu1 %v1310_v17, %s1203_s30 }
 0x31e   : > { %605 = vrot.lane.b32.xlu0 %v1319_v26, %s1203_s30  ;;  %s1142_s30 = scalar_lea.vmem %s1141_s25, 2048 }
 0x31f   : > { %p1144_p6 = scmp.lt.s32.totalorder %s1142_s30, %s1136_s23 }
 0x321   : > { %p1145_p7 = por %p1144_p6, %p1143_p5 }
 0x323   : > { %p1146_p8 = pnand %p1145_p7, %p1139_p4 }
 0x381   : > { %v557_v56 = vpop.xlane.xlu1 %556 }
 0x385   : > { %v551_v57 = vpop.xlane.xlu1 %550  ;;  %v560_v58 = vpop.xlane.xlu0 %559 }
 0x386   : > { %1108 = vrcp.f32 %v551_v57  ;;  %v933_v57 = vld [vmem:[%s1483_s5] ss:$0 sm:$0xff] }
 0x387   : > { %1110 = vrcp.f32 %v560_v58 }
 0x388   : > { %1112 = vrcp.f32 %v557_v56 }
 0x389   : > { %v569_v59 = vpop.xlane.xlu1 %568  ;;  %v554_v60 = vpop.xlane.xlu0 %553 }
 0x38a   : > { %1114 = vrcp.f32 %v554_v60  ;;  %v1204_v60 = vmov 0.0  }
 0x38d   : > { %v563_v61 = vpop.xlane.xlu1 %562  ;;  %v572_v62 = vpop.xlane.xlu0 %571 }
 0x38e   : > { %1116 = vrcp.f32 %v563_v61 }
 0x38f   : > { %1118 = vrcp.f32 %v572_v62 }
 0x391   : > { %v566_v14 = vpop.xlane.xlu0 %565  ;;  %v604_v63 = vpop.permute.xlu1 %603 }
 0x392   : > { %1120 = vrcp.f32 %v566_v14 }
 0x393   : > { %1122 = vrcp.f32 %v569_v59  ;;  %v1109_v17 = vpop.eup %1108 }
 0x394   : > { %v1111_v26 = vpop.eup %1110  ;;  %v581_v2 = vmul.f32 %v1109_v17, %v1095_v42 }
 0x395   : > { %v606_v0 = vpop.permute.xlu0 %605  ;;  %v1113_v1 = vpop.eup %1112  ;;  %v584_v4 = vmul.f32 %v1111_v26, %v1097_v43 }
 0x396   : > { %1011 = vmatprep.subr.bf16.mxu0 %v606_v0  ;;  %v583_v7 = vmul.f32 %v1113_v1, %v1093_v40  ;;  %v602_v8 = vpop.permute.xlu1 %601  ;;  %v589_v9 = vsel %vm1341_vm2, %v581_v2, 0.0 }
 0x397   : > { %1012 = vmatpush3.bf16.msra.mxu0 %v606_v0  ;;  %v1115_v3 = vpop.eup %1114  ;;  %v592_v13 = vsel %vm1341_vm2, %v584_v4, 0.0 }
 0x398   : > { %1013 = vmatprep.subr.bf16.mxu0 %v604_v63  ;;  %v582_v5 = vmul.f32 %v1115_v3, %v1099_v46  ;;  %v591_v19 = vsel %vm1341_vm2, %v583_v7, 0.0 }
 0x399   : > { %v598_v21 = vpack.c.bf16 %v592_v13, %v591_v19 }
 0x39a   : > { %v590_v10 = vsel %vm1341_vm2, %v582_v5, 0.0 }
 0x39b   : > { %v1117_v6 = vpop.eup %1116  ;;  %1014 = vmatpush3.bf16.msra.mxu0 %v604_v63  ;;  %v597_v11 = vpack.c.bf16 %v590_v10, %v589_v9 }
 0x39c   : > { %1015 = vmatprep.subr.bf16.mxu0 %v602_v8  ;;  %v1119_v15 = vpop.eup %1118  ;;  %v585_v16 = vmul.f32 %v1117_v6, %v1103_v50 }
 0x39d   : > { %1017 = vmatprep.mubr.msk.bf16.mxu0 %vm500_vm3, %v597_v11  ;;  %v588_v24 = vmul.f32 %v1119_v15, %v1105_v51 }
 0x39e   : > { %v593_v25 = vsel %vm1341_vm2, %v585_v16, 0.0 }
 0x39f   : > { %v1121_v18 = vpop.eup %1120  ;;  %1016 = vmatpush3.bf16.msra.mxu0 %v602_v8  ;;  %v596_v29 = vsel %vm1341_vm2, %v588_v24, 0.0 }
 0x3a0   : > { %v1123_v20 = vpop.eup %1122  ;;  %v586_v22 = vmul.f32 %v1121_v18, %v1107_v54  ;;  %1025 = vmatprep.subr.bf16.mxu0 %v1091_v12  ;;  %v366_v54 = vshrl.u32 %v363_v35, 7 }
 0x3a1   : > { %v587_v23 = vmul.f32 %v1123_v20, %v1360_v47 }
 0x3a2   : > { %1018 = vmatmul.mubr.msk.bf16.vlgmr.msra.gmra.mxu0 %vm500_vm3, %v598_v21  ;;  %v594_v27 = vsel %vm1341_vm2, %v586_v22, 0.0  ;;  %v368_v55 = vadd.s32 16, %v366_v54  ;;  %v369_v56 = vadd.s32 24, %v366_v54  ;;  %vm791_vm5 = vcmp.lt.s32.totalorder %v366_v54, %v1338_v37 }
 0x3a3   : > { %v599_v28 = vpack.c.bf16 %v594_v27, %v593_v25  ;;  %1026 = vmatpush3.bf16.msra.mxu0 %v1091_v12  ;;  %v595_v30 = vsel %vm1341_vm2, %v587_v23, 0.0  ;;  %v367_v58 = vadd.s32 8, %v366_v54  ;;  %v372_v35 = vadd.s32 48, %v366_v54 }
 0x3a4   : > { %v600_v31 = vpack.c.bf16 %v596_v29, %v595_v30  ;;  %vm793_vm4 = vcmp.lt.s32.totalorder %v368_v55, %v1338_v37  ;;  %vm794_vm6 = vcmp.lt.s32.totalorder %v369_v56, %v1338_v37  ;;  %v939_v17 = vsel %vm791_vm5, 1.0, %v1204_v60 }
 0x3a5   : > { %1021 = vmatprep.mubr.msk.bf16.mxu0 %vm500_vm3, %v599_v28  ;;  %v941_v61 = vsel %vm793_vm4, 1.0, %v1204_v60  ;;  %vm792_vm7 = vcmp.lt.s32.totalorder %v367_v58, %v1338_v37  ;;  %v370_v26 = vadd.s32 32, %v366_v54  ;;  %v942_v2 = vsel %vm794_vm6, 1.0, %v1204_v60 }
 0x3a6   : > { %vm797_vm8 = vcmp.lt.s32.totalorder %v372_v35, %v1338_v37  ;;  %v373_v5 = vadd.s32 56, %v366_v54  ;;  %v940_v7 = vsel %vm792_vm7, 1.0, %v1204_v60  ;;  %v371_v10 = vadd.s32 40, %v366_v54 }
 0x3a7   : > { %vm795_vm9 = vcmp.lt.s32.totalorder %v370_v26, %v1338_v37  ;;  %v945_v12 = vsel %vm797_vm8, 1.0, %v1204_v60 }
 0x3a8   : > { %vm798_vm10 = vcmp.lt.s32.totalorder %v373_v5, %v1338_v37  ;;  %v943_v18 = vsel %vm795_vm9, 1.0, %v1204_v60  ;;  %vm796_vm11 = vcmp.lt.s32.totalorder %v371_v10, %v1338_v37 }
 0x3a9   : > { %v946_v22 = vsel %vm798_vm10, 1.0, %v1204_v60  ;;  %v944_v28 = vsel %vm796_vm11, 1.0, %v1204_v60 }
 0x3aa   : > { %1022 = vmatmul.mubr.msk.bf16.gmra.mxu0 %vm500_vm3, %v600_v31 }
 0x462   : > { %v1019_v32 = vpop.f32.mrf.mxu0 }
 0x463   : > { %v692_v42 = vmax.f32 %v1019_v32, 0.0 }
 0x464   : > { %v659_v33 = vpop.f32.mrf.mxu0 }
 0x465   : > { %v690_v40 = vmax.f32 %v659_v33, 0.0 }
 0x466   : > { %v1020_v34 = vpop.f32.mrf.mxu0 }
 0x467   : > { %v693_v36 = vmax.f32 %v1020_v34, 0.0 }
 0x468   : > { %v662_v38 = vpop.f32.mrf.mxu0 }
 0x469   : > { %v691_v41 = vmax.f32 %v662_v38, 0.0  ;;  %v699_v45 = vpack.c.bf16 %v693_v36, %v692_v42 }
 0x46a   : > { %v1023_v43 = vpop.f32.mrf.mxu0 }
 0x46b   : > { %v698_v44 = vpack.c.bf16 %v691_v41, %v690_v40  ;;  %v696_v51 = vmax.f32 %v1023_v43, 0.0 }
 0x46c   : > { %v675_v46 = vpop.f32.mrf.mxu0 }
 0x46d   : > { %1027 = vmatprep.mubr.msk.bf16.mxu0 %vm391_vm1, %v698_v44  ;;  %v694_v49 = vmax.f32 %v675_v46, 0.0 }
 0x46e   : > { %v1024_v39 = vpop.f32.mrf.mxu0  ;;  %1028 = vmatmul.mubr.msk.bf16.vlgmr.msra.gmra.mxu0 %vm391_vm1, %v699_v45 }
 0x46f   : > { %v697_v47 = vmax.f32 %v1024_v39, 0.0 }
 0x470   : > { %v678_v48 = vpop.f32.mrf.mxu0 }
 0x471   : > { %v695_v50 = vmax.f32 %v678_v48, 0.0  ;;  %v701_v53 = vpack.c.bf16 %v697_v47, %v696_v51 }
 0x473   : > { %v700_v52 = vpack.c.bf16 %v695_v50, %v694_v49 }
 0x475   : > { %1031 = vmatprep.mubr.msk.bf16.mxu0 %vm391_vm1, %v700_v52 }
 0x476   : > { %1032 = vmatmul.mubr.msk.bf16.gmra.mxu0 %vm391_vm1, %v701_v53 }
 0x52e   : > { %v1029_v59 = vpop.f32.mrf.mxu0 }
 0x52f   : > { %v769_v62 = vadd.f32 %v1029_v59, %v933_v57 }
 0x530   : > { %v760_v14 = vpop.f32.mrf.mxu0 }
 0x531   : > { %v817_v63 = vmul.f32 %v941_v61, %v769_v62  ;;  %v761_v0 = vadd.f32 %v933_v57, %v760_v14 }
 0x532   : > { %v1030_v1 = vpop.f32.mrf.mxu0 }
 0x533   : > { %825 = vst [vmem:[%s1413_s17 + $0x10] sm:$0xff] %v817_v63  ;;  %v815_v3 = vmul.f32 %v939_v17, %v761_v0  ;;  %v772_v4 = vadd.f32 %v1030_v1, %v933_v57 }
 0x534   : > { %v763_v6 = vpop.f32.mrf.mxu0 }
 0x535   : > { %823 = vst [vmem:[%s1413_s17] sm:$0xff] %v815_v3  ;;  %v818_v8 = vmul.f32 %v942_v2, %v772_v4  ;;  %v764_v9 = vadd.f32 %v933_v57, %v763_v6 }
 0x536   : > { %v1033_v11 = vpop.f32.mrf.mxu0 }
 0x537   : > { %826 = vst [vmem:[%s1413_s17 + $0x18] sm:$0xff] %v818_v8  ;;  %v816_v13 = vmul.f32 %v940_v7, %v764_v9  ;;  %v785_v15 = vadd.f32 %v1033_v11, %v933_v57 }
 0x538   : > { %v776_v16 = vpop.f32.mrf.mxu0 }
 0x539   : > { %824 = vst [vmem:[%s1413_s17 + $0x8] sm:$0xff] %v816_v13  ;;  %v821_v19 = vmul.f32 %v945_v12, %v785_v15  ;;  %v777_v20 = vadd.f32 %v933_v57, %v776_v16 }
 0x53a   : > { %v1034_v21 = vpop.f32.mrf.mxu0 }
 0x53b   : > { %829 = vst [vmem:[%s1413_s17 + $0x30] sm:$0xff] %v821_v19  ;;  %v819_v24 = vmul.f32 %v943_v18, %v777_v20  ;;  %v788_v25 = vadd.f32 %v1034_v21, %v933_v57 }
 0x53c   : > { %v779_v27 = vpop.f32.mrf.mxu0 }
 0x53d   : > { %827 = vst [vmem:[%s1413_s17 + $0x20] sm:$0xff] %v819_v24  ;;  %v822_v23 = vmul.f32 %v946_v22, %v788_v25  ;;  %v780_v29 = vadd.f32 %v933_v57, %v779_v27 }
 0x53f   : > { %830 = vst [vmem:[%s1413_s17 + $0x38] sm:$0xff] %v822_v23  ;;  %v820_v37 = vmul.f32 %v944_v28, %v780_v29 }
 0x541   : > { %828 = vst [vmem:[%s1413_s17 + $0x28] sm:$0xff] %v820_v37 }
 0x542   : > { %1149 = shalt.err (!%p1146_p8)
}
 0x543   : > { %s1150_s8 = scalar_lea.hbm %s1430_s22, 1024  ;;  %s1154_s14 = scalar_lea.hbm %s1484_s6, 2048 }
 0x544   : > { %p1151_p9 = scmp.ne.s32.totalorder %s1430_s22, %s1150_s8  ;;  %p1155_p0 = scmp.lt.s32.totalorder %s1430_s22, %s1484_s6 }
 0x545   : > { %p1156_p1 = scmp.lt.s32.totalorder %s1154_s14, %s1150_s8 }
 0x546   : > { %p1152_p12 = pnand %p1151_p9, %p1284_p10 }
 0x547   : > { %p1157_p2 = por %p1156_p1, %p1155_p0 }
 0x548   : > { %p1153_p13 = pneg %p1152_p12 }
 0x54a   : > { %p1158_p3 = pnand %p1157_p2, %p1153_p13 }
 0x54c   : > { %1161 = shalt.err (!%p1158_p3)
}
 0x54d   : > { %s1206_s17 = smov 128   ;;  %s1207_s18 = smov 8  }
 0x54e   : > { %1039 = dma.vmem_to_hbm [thread:$0]  (%p1284_p10), %s1432_s19, 1024, %s1430_s22, %s1438_s29, %s1206_s17, %s1206_s17, %s1207_s18  }
 0x54f PF: > { %p1045_p4 = scmp.ge.s32.totalorder %s1198_s28, 2  ;;  %s860_s20 = sand.u32 1, %s1186_s26  }
 0x550   : > { %s861_s21 = scalar_lea.sflag [#allocation5], %s860_s20 }
 0x551   : > { %p1042_p5 = pnand %p1045_p4, %p1288_p11 }
 0x553   : > { %p1043_p6 = pneg %p1042_p5 }
 0x555   : > { %1181 = dma.done.wait (%p1043_p6), %s861_s21, 1024  }
 0x556   : > { %1183 = vsyncadd (%p1043_p6), %s861_s21, 4294966272  ;;  %p22_p7 = scmp.ge.s32.totalorder %s1271_s7, 4   ;;  %s1489_s26 = smov %s1190_s27 }
 0x557   : > { %s1490_s27 = smov %s1194_s0  ;;  %s1491_s0 = smov %s1282_s10 }
 0x558   : > { %s1492_s28 = smov %s1271_s7  ;;  %24 = sbr.rel (!%p22_p7) target bundleno = 18 (0x12), region = 75 }
 0x55d   :  { %866 = vsyncpa [#allocation5], 1 }
 0x55e   :  { %868 = vsyncpa [#allocation5 + $0x1], 1 }

</bundles_post_ra>
